<compile_context>
chip_gen: v7x
topology: tpu7x:2x2x1
jax: 0.10.0
libtpu: 0.0.40
codegen_flags: <defaults>
</compile_context>

<pallas_src>
import functools

import jax
import jax.numpy as jnp
from jax.experimental import pallas as pl
from jax.experimental.pallas import tpu as pltpu


def _conv1d_ncl_kernel(xl_ref, xc_ref, xr_ref, w_ref, o_ref, *, T, Tt, H, K, pad):
    # xl_ref : (1, C_in, H)    H-wide block holding the left-halo columns
    # xc_ref : (1, C_in, Tt)   current time tile (time on the 128-wide lane axis)
    # xr_ref : (1, C_in, H)    H-wide block holding the right-halo columns
    # w_ref  : (K, C_out, C_in) full weight, tap-major, VMEM resident
    # o_ref  : (1, C_out, Tt)
    t = pl.program_id(1)
    f32 = jnp.float32

    center = xc_ref[0]                                         # (C_in, Tt)
    col = jax.lax.broadcasted_iota(jnp.int32, (1, Tt), 1)

    # Ragged last tile: columns past T hold uninitialized data.  Select (NOT
    # multiply) them to zero so they cannot poison valid outputs through the
    # shifted right-tap contribution.  Skipped at compile time when T % Tt == 0.
    if T % Tt != 0:
        center = jnp.where(t * Tt + col < T, center, 0.0)

    # Centre tap: aligned matmul, f32 value accumulation (no VMEM round trip).
    acc = jnp.dot(w_ref[pad], center, preferred_element_type=f32)

    for k in range(K):
        if k == pad:
            continue
        d = k - pad                                            # tap offset
        p = jnp.dot(w_ref[k], center, preferred_element_type=f32)
        # shifted[:, j] = p[:, j + d]  (XLU lane rotation; wrapped cols patched)
        shifted = pltpu.roll(p, shift=(-d) % Tt, axis=1)
        if d < 0:
            # Output columns [0, -d) wrapped around: they must read the last |d|
            # columns *before* this tile (zero "same" padding when t == 0).
            for j in range(-d):
                hcol = xl_ref[0, :, H + j + d:H + j + d + 1]   # (C_in, 1)
                hcol = jnp.where(t > 0, hcol, 0.0)
                patch = jnp.dot(w_ref[k], hcol, preferred_element_type=f32)
                shifted = jnp.where(col == j, patch, shifted)
        else:
            # Output columns [Tt-d, Tt) wrapped around: they must read the first
            # d columns *after* this tile (zero past T: "same" padding).
            for i in range(d):
                hcol = xr_ref[0, :, i:i + 1]                   # (C_in, 1)
                hcol = jnp.where((t + 1) * Tt + i < T, hcol, 0.0)
                patch = jnp.dot(w_ref[k], hcol, preferred_element_type=f32)
                shifted = jnp.where(col == Tt - d + i, patch, shifted)
        acc = acc + shifted

    o_ref[0] = acc.astype(o_ref.dtype)


def projector_forward(x_ncl, weight_oik, *, t_tile=None):
    """Conv1d(C_in -> C_out, K, stride=1, bias=False, padding=(K-1)//2).

    x_ncl:      (B, C_in, T)       (PyTorch NCL layout, kept as-is in HBM)
    weight_oik: (C_out, C_in, K)   (PyTorch layout)
    returns:    (B, C_out, T)
    """
    B, C_in, T = x_ncl.shape
    C_out, C_in_w, K = weight_oik.shape
    assert C_in == C_in_w
    assert K % 2 == 1, "'same' padding formula assumes odd kernel_size"
    pad = (K - 1) // 2

    # Generation-aware tiling: large tiles amortize halo reads + per-step
    # overhead; v7x only has 64 MiB VMEM per TensorCore, so stay at 1024 there.
    try:
        vmem_phys = pltpu.get_tpu_info().vmem_capacity_bytes
    except Exception:
        vmem_phys = 64 << 20                       # conservative (v7x per-TC)
    if t_tile is None:
        t_tile = 2048 if vmem_phys >= (96 << 20) else 1024

    Tt = t_tile if T >= t_tile else T              # time tile (lane dimension)
    H = 128 if T >= 128 else T                     # halo fetch granularity
    if T >= t_tile:
        assert Tt % H == 0
    assert pad <= H, "kernel_size too large for halo granularity"
    nt = pl.cdiv(T, Tt)
    n_hblk = pl.cdiv(T, H)
    tiles_h = max(Tt // H, 1)

    # Only the (tiny) weight is re-laid-out; the activation is untouched in HBM.
    w_koc = jnp.transpose(weight_oik, (2, 0, 1))   # (K, C_out, C_in)

    kernel = functools.partial(_conv1d_ncl_kernel, T=T, Tt=Tt, H=H, K=K, pad=pad)

    isz = x_ncl.dtype.itemsize
    # Double-buffered centre + two halo blocks + output, plus the resident weight.
    est = (2 * (C_in * Tt + 2 * C_in * H + C_out * Tt) * isz
           + 2 * K * C_out * C_in * isz)
    vmem_limit = int(min(max(3 * est, 16 << 20), (vmem_phys * 3) // 4))
    vmem_limit = int(min(max(vmem_limit, 2 * est), vmem_phys))

    cost = pl.CostEstimate(
        flops=2 * B * T * C_in * C_out * K,
        transcendentals=0,
        bytes_accessed=int(B * C_in * T * isz * (1.0 + 2.0 * H / Tt)   # halo over-read
                           + B * C_out * T * isz + K * C_out * C_in * isz),
    )

    return pl.pallas_call(
        kernel,
        out_shape=jax.ShapeDtypeStruct((B, C_out, T), x_ncl.dtype),
        grid_spec=pltpu.PrefetchScalarGridSpec(
            num_scalar_prefetch=0,
            grid=(B, nt),
            in_specs=[
                # Left-halo H-block (same array; clamped at t==0, masked in-kernel).
                pl.BlockSpec((1, C_in, H),
                             lambda b, t: (b, 0, jnp.maximum(t * tiles_h - 1, 0))),
                # Current time tile.
                pl.BlockSpec((1, C_in, Tt), lambda b, t: (b, 0, t)),
                # Right-halo H-block (clamped at the end, masked in-kernel).
                pl.BlockSpec((1, C_in, H),
                             lambda b, t: (b, 0, jnp.minimum((t + 1) * tiles_h,
                                                             n_hblk - 1))),
                # Weight: constant block index -> DMA'd once, stays VMEM-resident.
                pl.BlockSpec((K, C_out, C_in), lambda b, t: (0, 0, 0)),
            ],
            out_specs=pl.BlockSpec((1, C_out, Tt), lambda b, t: (b, 0, t)),
        ),
        compiler_params=pltpu.CompilerParams(
            dimension_semantics=("parallel", "parallel"),
            vmem_limit_bytes=vmem_limit,
        ),
        cost_estimate=cost,
    )(x_ncl, x_ncl, x_ncl, w_koc)


def _reference_conv1d(x_ncl, weight_oik):
    K = weight_oik.shape[-1]
    pad = (K - 1) // 2
    return jax.lax.conv_general_dilated(
        x_ncl, weight_oik,
        window_strides=(1,),
        padding=[(pad, pad)],
        dimension_numbers=("NCH", "OIH", "NCH"),
    )


if __name__ == "__main__":
    key = jax.random.PRNGKey(0)
    kx, kw, kx2 = jax.random.split(key, 3)

    # Small shapes consistent with Projector(input_channels=4, code_dim=8).
    B, C_in, T = 2, 4, 16
    code_dim, K = 8, 3
    x = jax.random.normal(kx, (B, C_in, T), dtype=jnp.float32)
    weight = jax.random.normal(kw, (code_dim, C_in, K), dtype=jnp.float32) * 0.1

    out = jax.block_until_ready(projector_forward(x, weight))
    ref = _reference_conv1d(x, weight)
    assert out.shape == (B, code_dim, T)
    assert jnp.allclose(out, ref, atol=1e-5, rtol=1e-5), "mismatch (single tile)"

    # Multi-tile path: interior halos + ragged last tile (1000 = 3*256 + 232).
    T2 = 1000
    x2 = jax.random.normal(kx2, (1, C_in, T2), dtype=jnp.float32)
    out2 = jax.block_until_ready(projector_forward(x2, weight, t_tile=256))
    ref2 = _reference_conv1d(x2, weight)
    assert jnp.allclose(out2, ref2, atol=1e-4, rtol=1e-4), "mismatch (multi tile)"

    print("KERNEL_OK")
</pallas_src>

<mosaic_0001>
module attributes {stable_mosaic.version = 11 : i64} {
  func.func @_conv1d_ncl_kernel(%arg0: i32, %arg1: i32, %arg2: memref<1x4x16xf32, #tpu.memory_space<vmem>>, %arg3: memref<1x4x16xf32, #tpu.memory_space<vmem>>, %arg4: memref<1x4x16xf32, #tpu.memory_space<vmem>>, %arg5: memref<3x8x4xf32, #tpu.memory_space<vmem>>, %arg6: memref<1x8x16xf32, #tpu.memory_space<vmem>>) attributes {dimension_semantics = [#tpu.dimension_semantics<parallel>, #tpu.dimension_semantics<parallel>], iteration_bounds = array<i64: 2, 1>, scalar_prefetch = 0 : i64, scratch_operands = 0 : i64, tpu.core_type = #tpu.core_type<tc>, window_params = [{transform_indices = @transform_0, window_bounds = array<i64: 1, 4, 16>}, {transform_indices = @transform_1, window_bounds = array<i64: 1, 4, 16>}, {transform_indices = @transform_2, window_bounds = array<i64: 1, 4, 16>}, {pipeline_mode = #tpu.pipeline_mode<synchronous>, transform_indices = @transform_3, window_bounds = array<i64: 3, 8, 4>}, {transform_indices = @transform_4, window_bounds = array<i64: 1, 8, 16>}]} {
    %c0 = arith.constant 0 : index
    %c0_0 = arith.constant 0 : index
    %c0_1 = arith.constant 0 : index
    %0 = vector.load %arg3[%c0, %c0_0, %c0_1] : memref<1x4x16xf32, #tpu.memory_space<vmem>>, vector<1x4x16xf32>
    %1 = vector.shape_cast %0 : vector<1x4x16xf32> to vector<4x16xf32>
    %2 = tpu.iota {dimensions = array<i32: 1>} : vector<1x16xi32>
    %c1 = arith.constant 1 : index
    %c0_2 = arith.constant 0 : index
    %c0_3 = arith.constant 0 : index
    %3 = vector.load %arg5[%c1, %c0_2, %c0_3] : memref<3x8x4xf32, #tpu.memory_space<vmem>>, vector<1x8x4xf32>
    %4 = vector.shape_cast %3 : vector<1x8x4xf32> to vector<8x4xf32>
    %cst = arith.constant dense<0.000000e+00> : vector<8x16xf32>
    %5 = tpu.matmul %4, %1, %cst {dimension_numbers = #tpu.dot_dimension_numbers<[1], [0], [0], [1], [0, 0, 1, 1], [], []>} : vector<8x4xf32>, vector<4x16xf32>, vector<8x16xf32> -> vector<8x16xf32>
    %c0_4 = arith.constant 0 : index
    %c0_5 = arith.constant 0 : index
    %c0_6 = arith.constant 0 : index
    %6 = vector.load %arg5[%c0_4, %c0_5, %c0_6] : memref<3x8x4xf32, #tpu.memory_space<vmem>>, vector<1x8x4xf32>
    %7 = vector.shape_cast %6 : vector<1x8x4xf32> to vector<8x4xf32>
    %cst_7 = arith.constant dense<0.000000e+00> : vector<8x16xf32>
    %8 = tpu.matmul %7, %1, %cst_7 {dimension_numbers = #tpu.dot_dimension_numbers<[1], [0], [0], [1], [0, 0, 1, 1], [], []>} : vector<8x4xf32>, vector<4x16xf32>, vector<8x16xf32> -> vector<8x16xf32>
    %c1_i32 = arith.constant 1 : i32
    %9 = tpu.dynamic_rotate %8 by %c1_i32 dim 1 : vector<8x16xf32>, i32 -> vector<8x16xf32>
    %c0_8 = arith.constant 0 : index
    %c0_9 = arith.constant 0 : index
    %c15 = arith.constant 15 : index
    %10 = vector.load %arg2[%c0_8, %c0_9, %c15] : memref<1x4x16xf32, #tpu.memory_space<vmem>>, vector<1x4x1xf32>
    %11 = vector.shape_cast %10 : vector<1x4x1xf32> to vector<4x1xf32>
    %c0_i32 = arith.constant 0 : i32
    %12 = arith.cmpi sgt, %arg1, %c0_i32 : i32
    %cst_10 = arith.constant 0.000000e+00 : f32
    %13 = vector.broadcast %cst_10 : f32 to vector<4x1xf32>
    %14 = arith.select %12, %11, %13 : vector<4x1xf32>
    %c0_11 = arith.constant 0 : index
    %c0_12 = arith.constant 0 : index
    %c0_13 = arith.constant 0 : index
    %15 = vector.load %arg5[%c0_11, %c0_12, %c0_13] : memref<3x8x4xf32, #tpu.memory_space<vmem>>, vector<1x8x4xf32>
    %16 = vector.shape_cast %15 : vector<1x8x4xf32> to vector<8x4xf32>
    %cst_14 = arith.constant dense<0.000000e+00> : vector<8x1xf32>
    %17 = tpu.matmul %16, %14, %cst_14 {dimension_numbers = #tpu.dot_dimension_numbers<[1], [0], [0], [1], [0, 0, 1, 1], [], []>} : vector<8x4xf32>, vector<4x1xf32>, vector<8x1xf32> -> vector<8x1xf32>
    %c0_i32_15 = arith.constant 0 : i32
    %18 = vector.broadcast %c0_i32_15 : i32 to vector<1x16xi32>
    %19 = arith.cmpi eq, %2, %18 : vector<1x16xi32>
    %20 = vector.shape_cast %19 : vector<1x16xi1> to vector<1x16xi1>
    %21 = vector.broadcast %20 : vector<1x16xi1> to vector<8x16xi1>
    %22 = vector.shape_cast %17 : vector<8x1xf32> to vector<8x1xf32>
    %23 = vector.broadcast %22 : vector<8x1xf32> to vector<8x16xf32>
    %24 = arith.select %21, %23, %9 : vector<8x16xi1>, vector<8x16xf32>
    %25 = arith.addf %5, %24 : vector<8x16xf32>
    %c2 = arith.constant 2 : index
    %c0_16 = arith.constant 0 : index
    %c0_17 = arith.constant 0 : index
    %26 = vector.load %arg5[%c2, %c0_16, %c0_17] : memref<3x8x4xf32, #tpu.memory_space<vmem>>, vector<1x8x4xf32>
    %27 = vector.shape_cast %26 : vector<1x8x4xf32> to vector<8x4xf32>
    %cst_18 = arith.constant dense<0.000000e+00> : vector<8x16xf32>
    %28 = tpu.matmul %27, %1, %cst_18 {dimension_numbers = #tpu.dot_dimension_numbers<[1], [0], [0], [1], [0, 0, 1, 1], [], []>} : vector<8x4xf32>, vector<4x16xf32>, vector<8x16xf32> -> vector<8x16xf32>
    %c15_i32 = arith.constant 15 : i32
    %29 = tpu.dynamic_rotate %28 by %c15_i32 dim 1 : vector<8x16xf32>, i32 -> vector<8x16xf32>
    %c0_19 = arith.constant 0 : index
    %c0_20 = arith.constant 0 : index
    %c0_21 = arith.constant 0 : index
    %30 = vector.load %arg4[%c0_19, %c0_20, %c0_21] : memref<1x4x16xf32, #tpu.memory_space<vmem>>, vector<1x4x1xf32>
    %31 = vector.shape_cast %30 : vector<1x4x1xf32> to vector<4x1xf32>
    %c1_i32_22 = arith.constant 1 : i32
    %32 = arith.addi %arg1, %c1_i32_22 : i32
    %c16_i32 = arith.constant 16 : i32
    %33 = arith.muli %32, %c16_i32 : i32
    %c0_i32_23 = arith.constant 0 : i32
    %34 = arith.addi %33, %c0_i32_23 : i32
    %c16_i32_24 = arith.constant 16 : i32
    %35 = arith.cmpi slt, %34, %c16_i32_24 : i32
    %cst_25 = arith.constant 0.000000e+00 : f32
    %36 = vector.broadcast %cst_25 : f32 to vector<4x1xf32>
    %37 = arith.select %35, %31, %36 : vector<4x1xf32>
    %c2_26 = arith.constant 2 : index
    %c0_27 = arith.constant 0 : index
    %c0_28 = arith.constant 0 : index
    %38 = vector.load %arg5[%c2_26, %c0_27, %c0_28] : memref<3x8x4xf32, #tpu.memory_space<vmem>>, vector<1x8x4xf32>
    %39 = vector.shape_cast %38 : vector<1x8x4xf32> to vector<8x4xf32>
    %cst_29 = arith.constant dense<0.000000e+00> : vector<8x1xf32>
    %40 = tpu.matmul %39, %37, %cst_29 {dimension_numbers = #tpu.dot_dimension_numbers<[1], [0], [0], [1], [0, 0, 1, 1], [], []>} : vector<8x4xf32>, vector<4x1xf32>, vector<8x1xf32> -> vector<8x1xf32>
    %c15_i32_30 = arith.constant 15 : i32
    %41 = vector.broadcast %c15_i32_30 : i32 to vector<1x16xi32>
    %42 = arith.cmpi eq, %2, %41 : vector<1x16xi32>
    %43 = vector.shape_cast %42 : vector<1x16xi1> to vector<1x16xi1>
    %44 = vector.broadcast %43 : vector<1x16xi1> to vector<8x16xi1>
    %45 = vector.shape_cast %40 : vector<8x1xf32> to vector<8x1xf32>
    %46 = vector.broadcast %45 : vector<8x1xf32> to vector<8x16xf32>
    %47 = arith.select %44, %46, %29 : vector<8x16xi1>, vector<8x16xf32>
    %48 = arith.addf %25, %47 : vector<8x16xf32>
    %c0_31 = arith.constant 0 : index
    %c0_32 = arith.constant 0 : index
    %c0_33 = arith.constant 0 : index
    %49 = vector.load %arg6[%c0_31, %c0_32, %c0_33] : memref<1x8x16xf32, #tpu.memory_space<vmem>>, vector<1x8x16xf32>
    %50 = vector.shape_cast %49 : vector<1x8x16xf32> to vector<8x16xf32>
    %51 = vector.shape_cast %48 : vector<8x16xf32> to vector<1x8x16xf32>
    tpu.vector_store %arg6[%c0_31, %c0_32, %c0_33], %51 {strides = array<i32>} : memref<1x8x16xf32, #tpu.memory_space<vmem>>, vector<1x8x16xf32>,
    return
  }
  func.func @transform_0(%arg0: i32, %arg1: i32) -> (i32, i32, i32) {
    %c1_i32 = arith.constant 1 : i32
    %0 = arith.muli %arg1, %c1_i32 : i32
    %c1_i32_0 = arith.constant 1 : i32
    %1 = arith.subi %0, %c1_i32_0 : i32
    %c0_i32 = arith.constant 0 : i32
    %2 = arith.maxsi %1, %c0_i32 : i32
    %c0_i32_1 = arith.constant 0 : i32
    %c0_i32_2 = arith.constant 0 : i32
    return %arg0, %c0_i32_1, %2 : i32, i32, i32
  }
  func.func @transform_1(%arg0: i32, %arg1: i32) -> (i32, i32, i32) {
    %c0_i32 = arith.constant 0 : i32
    %c0_i32_0 = arith.constant 0 : i32
    return %arg0, %c0_i32, %arg1 : i32, i32, i32
  }
  func.func @transform_2(%arg0: i32, %arg1: i32) -> (i32, i32, i32) {
    %c1_i32 = arith.constant 1 : i32
    %0 = arith.addi %arg1, %c1_i32 : i32
    %c1_i32_0 = arith.constant 1 : i32
    %1 = arith.muli %0, %c1_i32_0 : i32
    %c0_i32 = arith.constant 0 : i32
    %2 = arith.minsi %1, %c0_i32 : i32
    %c0_i32_1 = arith.constant 0 : i32
    %c0_i32_2 = arith.constant 0 : i32
    return %arg0, %c0_i32_1, %2 : i32, i32, i32
  }
  func.func @transform_3(%arg0: i32, %arg1: i32) -> (i32, i32, i32) {
    %c0_i32 = arith.constant 0 : i32
    %c0_i32_0 = arith.constant 0 : i32
    %c0_i32_1 = arith.constant 0 : i32
    %c0_i32_2 = arith.constant 0 : i32
    return %c0_i32, %c0_i32_0, %c0_i32_1 : i32, i32, i32
  }
  func.func @transform_4(%arg0: i32, %arg1: i32) -> (i32, i32, i32) {
    %c0_i32 = arith.constant 0 : i32
    %c0_i32_0 = arith.constant 0 : i32
    return %arg0, %c0_i32, %arg1 : i32, i32, i32
  }
}

</mosaic_0001>

<bundles_post_ra>
// kernel: tpu_custom_call.1
= control target key start
LH: loop header
LB: loop body
LE: loop exit
PB: predicated region body
PF: predicated region fallthrough
CT: control target
= control target key end

     0   :  { %9 = vsyncpa [#allocation3], 0  ;;  %s1239_s0 = inlined_call_operand.vmem [shape: f32[2,4,16], index: 0, kind: input, shape index: {}]   ;;  %s1240_s1 = inlined_call_operand.vmem [shape: f32[2,4,16], index: 1, kind: input, shape index: {}]   ;;  %s1241_s2 = inlined_call_operand.vmem [shape: f32[2,4,16], index: 2, kind: input, shape index: {}]   ;;  %s1242_s3 = inlined_call_operand.vmem [shape: f32[3,8,4], index: 3, kind: input, shape index: {}]   ;;  %s1243_s4 = inlined_call_operand.hbm [shape: f32[2,8,16], index: 4, kind: output, shape index: {}]  }
   0x1   :  { %11 = vsyncpa [#allocation3 + $0x1], 0  ;;  %s1102_s15 = smov 0   ;;  %s1104_s16 = smov 0  }
   0x2   :  { %s1106_s17 = smov 0   ;;  %s1108_s0 = smov 0  }
   0x3   :  { %s1110_s18 = smov 0   ;;  %s1112_s19 = smov 0  }
   0x4 LB: > { %s868_s2 = sadd.s32 4294967295, %s1068_s19   ;;  %s869_s20 = sadd.s32 4294967294, %s1068_s19   ;;  %s1068_s19 = sphi %s1112_s19, %s17_s19   ;;  %s1064_s18 = sphi %s1110_s18, %s1250_s18   ;;  %s1060_s0 = sphi %s1108_s0, %s1249_s0   ;;  %s1056_s17 = sphi %s1106_s17, %s1248_s17   ;;  %s1052_s16 = sphi %s1104_s16, %s1247_s16   ;;  %s1048_s15 = sphi %s1102_s15, %s1246_s15  }
   0x5   : > { %s29_s21 = sadd.s32 1, %s1064_s18  ;;  %s155_s22 = sadd.s32 1, %s1056_s17 }
   0x6   : > { %p31_p0 = scmp.ge.s32.totalorder %s29_s21, 2  ;;  %p165_p1 = scmp.ne.s32.totalorder %s1056_s17, %s1052_s16 }
   0x7   : > { %p166_p2 = scmp.eq.s32.totalorder %s868_s2, 1  ;;  %p171_p3 = scmp.ne.s32.totalorder %s1052_s16, %s1048_s15 }
   0x8   : > { %s1252_s21 = smov (%p31_p0, %s29_s21), 0  ;;  %p172_p5 = scmp.eq.s32.totalorder %s869_s20, 1 }
   0x9   : > { %p1142_p4 = por %p166_p2, %p165_p1  ;;  %s150_s24 = ssub.s32 %s1064_s18, %s1252_s21 }
   0xa   : > { %p872_p6 = scmp.ge.s32.totalorder %s1068_s19, 1  ;;  %p153_p7 = scmp.eq.s32.totalorder %s150_s24, 0 }
   0xb   : > { %p1149_p8 = por %p172_p5, %p171_p3  ;;  %p235_p9 = scmp.lt.s32.totalorder %s1068_s19, 3 }
   0xc   : > { %s1155_s26 = scalar_select %p153_p7, %s1056_s17, %s155_s22  }
   0xd   : > { %p236_p10 = pnand %p872_p6, %p235_p9 }
   0xe   : > { %p296_p11 = scmp.lt.s32.totalorder (!%p236_p10), %s1060_s0, 1  ;;  %v1070_v0 = vmov (!%p236_p10), 0.0   ;;  %s1071_s27 = smov (!%p236_p10), 113   ;;  %vm1072_vm0 = vmmov (!%p236_p10), 0   ;;  %vm326_vm1 = vcmask (!%p236_p10), 1043456   ;;  %v321_v1 = vld [vmem:[%s1242_s3] sm:$0xff] (!%p236_p10)  ;;  %v317_v25 = vlaneseq (!%p236_p10) }
   0xf   : > { %239 = sbr.rel (%p236_p10) target bundleno = 711 (0x2c7), region = 36  ;;  %414 = vrot.lane.b32.xlu0 (!%p236_p10), %v1070_v0, %s1071_s27  ;;  %902 = vmatprep.subr.mxu0 (!%p236_p10), %v1070_v0  ;;  %vm322_vm2 = vcmask (!%p236_p10), 31744   ;;  %v884_v4 = vld [vmem:[%s1242_s3 + $0x10] sm:$0xff] (!%p236_p10)  ;;  %v877_v5 = vld [vmem:[%s1242_s3 + $0x8] sm:$0xff] (!%p236_p10)  ;;  %v1073_v6 = vmov (!%p236_p10), 0   ;;  %s1074_s13 = smov (!%p236_p10), 16  }
  0x10   : > { %904 = vmatprep.mubr.msk.f32.mxu0 (!%p236_p10), %vm1072_vm0, %v1070_v0  ;;  %907 = vmatprep.subr.mxu1 (!%p236_p10), %v1070_v0  ;;  %vm400_vm3 = vcmask (!%p236_p10), 1047680   ;;  %s1075_s14 = smov (!%p236_p10), 127   ;;  %v318_v27 = vand.u32 (!%p236_p10), 127, %v317_v25  ;;  %s280_s2 = sand.u32 (!%p236_p10), 1, %s1052_s16   ;;  %vm750_vm6 = vcmask (!%p236_p10), 130048  }
  0x11   : > { %909 = vmatprep.mubr.msk.f32.mxu1 (!%p236_p10), %vm1072_vm0, %v1070_v0  ;;  %988 = vset.pattern.permute.xlu1 (!%p236_p10), %v1073_v6  ;;  %s873_s20 = sshll.u32 (!%p236_p10), %s280_s2, 3  ;;  %s889_s22 = sshll.u32 (!%p236_p10), %s1060_s0, 7 }
  0x12   : > { %989 = vset.pattern.permute.xlu0 (!%p236_p10), %v1073_v6  ;;  %vm488_vm4 = vcmp.eq.s32.totalorder (!%p236_p10), %v318_v27, 0  ;;  %vm736_vm5 = vcmp.eq.s32.totalorder (!%p236_p10), %v318_v27, 15  ;;  %s282_s24 = scalar_lea.vmem (!%p236_p10), [#allocation2], %s873_s20  ;;  %s1192_s30 = scalar_lea.hbm (!%p236_p10), %s1243_s4, %s889_s22 }
  0x13   : > { %s753_s5 = scalar_lea.sflag (!%p236_p10), [#allocation3], %s280_s2 }
  0x16   : > { %s297_s28 = scalar_select %p296_p11, %s1060_s0, 1 }
  0x18   : > { %s875_s29 = sshll.u32 %s297_s28, 2 }
  0x19   : > { %s302_s6 = scalar_lea.vmem %s1240_s1, %s875_s29 }
  0x1a   : > { %v316_v2 = vld [vmem:[%s302_s6] sm:$0xf]  ;;  %s1076_s6 = smov [#allocation2]  }
  0x1b   : > { %903 = vmatpush3.msk.msra.mxu0 %vm326_vm1, %v316_v2  ;;  %s994_s7 = sshll.u32 %s1076_s6, 4  ;;  %s995_s7 = int_to_ptr.vmem [resolvable:$false] %s994_s7 }
  0x1c   : > { %905 = vmatmul.mubr.msk.f32.vlgmr.msra.gmra.mrb[0].mxu0 %vm322_vm2, %v321_v1  ;;  %912 = vmatprep.subr.mxu0 %v1070_v0  ;;  %s996_s8 = scalar_lea.vmem %s995_s7, 256 }
  0x1d   : > { %913 = vmatpush3.msk.msra.mxu0 %vm326_vm1, %v316_v2  ;;  %914 = vmatprep.mubr.msk.f32.mxu0 %vm1072_vm0, %v1070_v0 }
  0x1e   : > { %922 = vmatprep.subr.mxu0 %v1070_v0 }
  0x20   : > { %915 = vmatmul.mubr.msk.f32.vlgmr.msra.gmra.mrb[2].mxu0 %vm322_vm2, %v877_v5 }
  0x21   : > { %923 = vmatpush3.msra.mxu0 %v1070_v0  ;;  %924 = vmatprep.mubr.msk.f32.mxu0 %vm1072_vm0, %v1070_v0 }
  0x24   : > { %925 = vmatmul.mubr.msk.f32.vlgmr.msra.gmra.mrb[4].mxu0 %vm322_vm2, %v884_v4 }
  0x81   : > { %v415_v3 = vpop.permute.xlu0 %414 }
  0x82   : > { %908 = vmatpush3.msk.msra.mxu1 %vm326_vm1, %v415_v3 }
  0x83   : > { %910 = vmatmul.mubr.msk.f32.vlgmr.msra.gmra.mrb[0].mxu1 %vm322_vm2, %v321_v1  ;;  %917 = vmatprep.subr.mxu1 %v1070_v0 }
  0x84   : > { %918 = vmatpush3.msk.msra.mxu1 %vm326_vm1, %v316_v2  ;;  %919 = vmatprep.mubr.msk.f32.mxu1 %vm1072_vm0, %v1070_v0 }
  0x87   : > { %920 = vmatmul.mubr.msk.f32.vlgmr.msra.gmra.mrb[2].mxu1 %vm322_vm2, %v884_v4 }
  0xef   : > { %v396_v7 = vpop.f32.mrb[0].mxu0 }
  0xf0   : > { %401 = vrot.lane.b32.xlu0 %v396_v7, %s1074_s13  ;;  %v906_v8 = vpop.f32.mrb[1].mxu0 }
  0xf3   : > { %v570_v15 = vpop.f32.mrb[2].mxu0 }
  0xf4   : > { %v916_v16 = vpop.f32.mrb[3].mxu0 }
  0xf7   : > { %v732_v17 = vpop.f32.mrb[4].mxu0 }
  0xf8   : > { %v926_v18 = vpop.f32.mrb[5].mxu0 }
 0x156   : > { %v484_v9 = vpop.f32.mrb[0].mxu1 }
 0x157   : > { %v911_v10 = vpop.f32.mrb[1].mxu1 }
 0x15a   : > { %v645_v11 = vpop.f32.mrb[2].mxu1 }
 0x15b   : > { %649 = vrot.lane.b32.xlu1 %v645_v11, %s1074_s13  ;;  %v921_v12 = vpop.f32.mrb[3].mxu1 }
 0x162   : > { %v402_v13 = vpop.permute.xlu0 %401 }
 0x163   : > { %v403_v14 = vsel %vm400_vm3, %v402_v13, %v396_v7 }
 0x164   : > { %404 = vrot.lane.b32.xlu1 %v403_v14, %s1074_s13 }
 0x168   : > { %493 = vperm.xlu1 %988, %v484_v9  }
 0x1cd   : > { %v650_v19 = vpop.permute.xlu1 %649 }
 0x1ce   : > { %v651_v20 = vsel %vm400_vm3, %v650_v19, %v645_v11 }
 0x1cf   : > { %652 = vrot.lane.b32.xlu0 %v651_v20, %s1074_s13 }
 0x1d3   : > { %741 = vperm.xlu0 %989, %v732_v17  }
 0x1d6   : > { %v405_v21 = vpop.permute.xlu1 %404 }
 0x1d7   : > { %v406_v22 = vsel %vm400_vm3, %v405_v21, %v396_v7 }
 0x1d8   : > { %497 = vrot.lane.b32.xlu1 %v406_v22, %s1071_s27  ;;  %s767_s27 = sshll.u32 %s282_s24, 4  ;;  %s1194_s27 = int_to_ptr.vmem [resolvable:$true] %s767_s27 }
 0x1d9   : > { %s990_s0 = scalar_lea.vmem %s1194_s27, 128  ;;  %p997_p1 = scmp.lt.s32.totalorder %s1194_s27, %s995_s7 }
 0x1da   : > { %p991_p12 = scmp.ne.s32.totalorder %s1194_s27, %s990_s0  ;;  %p998_p2 = scmp.lt.s32.totalorder %s996_s8, %s990_s0 }
 0x1dc   : > { %p992_p13 = pnand %p991_p12, %p1142_p4  ;;  %p999_p3 = por %p998_p2, %p997_p1 }
 0x1de   : > { %p993_p0 = pneg %p992_p13 }
 0x1e0   : > { %p1000_p5 = pnand %p999_p3, %p993_p0 }
 0x1e7   : > { %v494_v26 = vpop.permute.xlu1 %493 }
 0x241   : > { %v653_v23 = vpop.permute.xlu0 %652 }
 0x242   : > { %v654_v24 = vsel %vm400_vm3, %v653_v23, %v645_v11 }
 0x243   : > { %745 = vrot.lane.b32.xlu1 %v654_v24, %s1075_s14 }
 0x24a   : > { %v498_v28 = vpop.permute.xlu1 %497 }
 0x24b   : > { %v500_v29 = vsel %vm488_vm4, %v494_v26, %v498_v28 }
 0x24c   : > { %v571_v31 = vadd.f32 %v570_v15, %v500_v29 }
 0x252   : > { %v742_v30 = vpop.permute.xlu0 %741 }
 0x2b5   : > { %v746_v32 = vpop.permute.xlu1 %745 }
 0x2b6   : > { %v748_v33 = vsel %vm736_vm5, %v742_v30, %v746_v32 }
 0x2b7   : > { %v749_v34 = vadd.f32 %v748_v33, %v571_v31 }
 0x2b9   : > { %751 = vst.msk [vmem:[%s282_s24] sm:$0xff] %vm750_vm6, %v749_v34 }
 0x2ba   : > { %1003 = shalt.err (!%p1000_p5)
}
 0x2bb   : > { %s1004_s9 = scalar_lea.hbm %s1192_s30, 128  ;;  %s1008_s12 = scalar_lea.hbm %s1243_s4, 256 }
 0x2bc   : > { %p1005_p6 = scmp.ne.s32.totalorder %s1192_s30, %s1004_s9  ;;  %p1009_p10 = scmp.lt.u32.totalorder %s1192_s30, %s1243_s4 }
 0x2bd   : > { %p1010_p11 = scmp.lt.u32.totalorder %s1008_s12, %s1004_s9  ;;  %p1012_p13 = scmp.lt.u32.totalorder %s1004_s9, %s1192_s30 }
 0x2be   : > { %p1006_p7 = pnand %p1005_p6, %p1142_p4 }
 0x2bf   : > { %p1011_p12 = por %p1010_p11, %p1009_p10 }
 0x2c0   : > { %p1007_p9 = pneg %p1006_p7 }
 0x2c1   : > { %p1013_p0 = por %p1012_p13, %p1011_p12 }
 0x2c3   : > { %p1014_p1 = pnand %p1013_p0, %p1007_p9 }
 0x2c5   : > { %1017 = shalt.err (!%p1014_p1)
}
 0x2c6   : > { %927 = dma.vmem_to_hbm [thread:$0]  (%p1142_p4), %s1194_s27, 128, %s1192_s30, %s753_s5  }
 0x2c7 PF: > { %p933_p2 = scmp.ge.s32.totalorder %s1068_s19, 2  ;;  %s779_s2 = sand.u32 1, %s1048_s15  }
 0x2c8   : > { %s780_s20 = scalar_lea.sflag [#allocation3], %s779_s2 }
 0x2c9   : > { %p930_p3 = pnand %p933_p2, %p1149_p8 }
 0x2cb   : > { %1043 = dma.done.wait (!%p930_p3), %s780_s20, 128  }
 0x2cc   : > { %1045 = vsyncadd (!%p930_p3), %s780_s20, 4294967168  ;;  %s17_s19 = sadd.s32 1, %s1068_s19   ;;  %s1246_s15 = smov %s1052_s16 }
 0x2cd   : > { %p14_p5 = scmp.ge.s32.totalorder %s17_s19, 4   ;;  %s1247_s16 = smov %s1056_s17 }
 0x2ce   : > { %s1248_s17 = smov %s1155_s26  ;;  %s1249_s0 = smov %s1064_s18 }
 0x2cf   : > { %s1250_s18 = smov %s1252_s21  ;;  %16 = sbr.rel (!%p14_p5) target bundleno = 4 (0x4), region = 79 }
 0x2d6   :  { %785 = vsyncpa [#allocation3], 1 }
 0x2d7   :  { %787 = vsyncpa [#allocation3 + $0x1], 1 }

</bundles_post_ra>
